<compile_context>
chip_gen: v5e
topology: v5e:2x2
jax: 0.10.0
libtpu: 0.0.40
codegen_flags: <defaults>
</compile_context>

<pallas_src>
import functools
import warnings

import jax
import jax.numpy as jnp
from jax.experimental import pallas as pl
from jax.experimental.pallas import tpu as pltpu

_LANES = 128
_MAX_BLOCK_ROWS = 1024   # (1024, 128) f32 = 512 KiB per input block


def _alpha_l1_kernel(scale_ref, pred_ref, targ_ref, out_ref, acc_ref, *, rows):
    i = pl.program_id(0)
    block_rows = acc_ref.shape[0]

    @pl.when(i == 0)
    def _():
        acc_ref[...] = jnp.zeros_like(acc_ref)

    # Global row / lane indices for this block.
    row_ids = i * block_rows + jax.lax.broadcasted_iota(
        jnp.int32, (block_rows, _LANES), 0)
    lane_ids = jax.lax.broadcasted_iota(jnp.int32, (block_rows, _LANES), 1)
    # Alpha channel sits at flat index % 4 == 3; since the lane width (128) is
    # a multiple of 4 this is a pure lane mask.  Rows past the real array
    # (partial tail block of the grid cdiv, or zero-padding) are masked too.
    valid = (row_ids < rows) & ((lane_ids % 4) == 3)

    diff = jnp.abs(pred_ref[...].astype(jnp.float32) -
                   targ_ref[...].astype(jnp.float32))
    acc_ref[...] += jnp.where(valid, diff, jnp.float32(0.0))

    @pl.when(i == pl.num_programs(0) - 1)
    def _():
        total = jnp.sum(acc_ref[...], keepdims=True)        # (1, 1)
        out_ref[...] = total * scale_ref[0]


def transmittance_loss(preds, targets, weight: float = 1.0):
    """JAX/Pallas equivalent of TransmittanceLoss.forward."""
    if ('image' not in preds or 'image' not in targets
            or preds['image'].shape[-1] != 4 or targets['image'].shape[-1] != 4):
        warnings.warn('Transmittance loss cannot be calculated due to missing '
                      'relevant inputs!')
        return jnp.float32(0.0)

    pred_img = preds['image']
    targ_img = targets['image']

    n_alpha = 1
    for d in pred_img.shape[:-1]:
        n_alpha *= d
    if n_alpha == 0:
        return jnp.float32(0.0)

    total = n_alpha * 4                         # all RGBA elements
    pred_flat = pred_img.reshape(-1)            # free reshape (layout unchanged)
    targ_flat = targ_img.reshape(-1)

    pad = (-total) % _LANES
    if pad:
        # TODO(synk): rare path (total not a multiple of 128); this pad copies.
        pred_flat = jnp.pad(pred_flat, (0, pad))
        targ_flat = jnp.pad(targ_flat, (0, pad))

    rows = (total + pad) // _LANES
    pred2d = pred_flat.reshape(rows, _LANES)    # free reshape
    targ2d = targ_flat.reshape(rows, _LANES)

    block_rows = rows if rows <= _MAX_BLOCK_ROWS else _MAX_BLOCK_ROWS
    num_blocks = pl.cdiv(rows, block_rows)

    # weight / n as a runtime scalar -> no recompile when weight changes.
    scale = jnp.asarray([weight], jnp.float32) / jnp.float32(n_alpha)

    kernel = functools.partial(_alpha_l1_kernel, rows=rows)

    out = pl.pallas_call(
        kernel,
        out_shape=jax.ShapeDtypeStruct((1, 1), jnp.float32),
        grid_spec=pltpu.PrefetchScalarGridSpec(
            num_scalar_prefetch=0,
            grid=(num_blocks,),
            in_specs=[
                pl.BlockSpec(memory_space=pltpu.SMEM),                  # scale
                pl.BlockSpec((block_rows, _LANES), lambda i: (i, 0)),   # pred
                pl.BlockSpec((block_rows, _LANES), lambda i: (i, 0)),   # target
            ],
            out_specs=pl.BlockSpec((1, 1), lambda i: (0, 0)),
            scratch_shapes=[pltpu.VMEM((block_rows, _LANES), jnp.float32)],
        ),
        compiler_params=pltpu.CompilerParams(
            dimension_semantics=("arbitrary",)),
    )(scale, pred2d, targ2d)

    # TODO(synk): on v7x a leading size-2 "parallel" grid axis with per-core
    # partial sums would use both TensorCores (~2x for very large images).
    return out[0, 0]


if __name__ == "__main__":
    key = jax.random.PRNGKey(0)
    k1, k2 = jax.random.split(key)
    B, H, W, C = 2, 16, 16, 4  # NHWC, C == 4 (RGBA), alpha = channel 3
    pred_img = jax.random.uniform(k1, (B, H, W, C), dtype=jnp.float32)
    targ_img = jax.random.uniform(k2, (B, H, W, C), dtype=jnp.float32)

    preds = {'image': pred_img}
    targets = {'image': targ_img}
    weight = 1.0

    loss = transmittance_loss(preds, targets, weight=weight)
    loss = jax.block_until_ready(loss)

    # Pure-JAX reference check.
    ref = jnp.mean(jnp.abs(pred_img[..., 3:] - targ_img[..., 3:])) * weight
    assert jnp.allclose(loss, ref, rtol=1e-5, atol=1e-6), (loss, ref)

    print("KERNEL_OK")
</pallas_src>

<mosaic_0001>
module attributes {stable_mosaic.version = 11 : i64} {
  func.func @_alpha_l1_kernel(%arg0: i32, %arg1: memref<1xf32, #tpu.memory_space<smem>>, %arg2: memref<16x128xf32, #tpu.memory_space<vmem>>, %arg3: memref<16x128xf32, #tpu.memory_space<vmem>>, %arg4: memref<1x1xf32, #tpu.memory_space<vmem>>, %arg5: memref<16x128xf32, #tpu.memory_space<vmem>>) attributes {dimension_semantics = [#tpu.dimension_semantics<arbitrary>], iteration_bounds = array<i64: 1>, scalar_prefetch = 0 : i64, scratch_operands = 1 : i64, tpu.core_type = #tpu.core_type<tc>, window_params = [{transform_indices = @transform_0, window_bounds = array<i64: 1>}, {transform_indices = @transform_1, window_bounds = array<i64: 16, 128>}, {transform_indices = @transform_2, window_bounds = array<i64: 16, 128>}, {pipeline_mode = #tpu.pipeline_mode<synchronous>, transform_indices = @transform_3, window_bounds = array<i64: 1, 1>}]} {
    %c0_i32 = arith.constant 0 : i32
    %0 = arith.cmpi eq, %arg0, %c0_i32 : i32
    %1 = arith.extui %0 : i1 to i32
    %c0_i32_0 = arith.constant 0 : i32
    %2 = arith.cmpi ne, %1, %c0_i32_0 : i32
    scf.if %2 {
      %cst_15 = arith.constant 0.000000e+00 : f32
      %41 = vector.broadcast %cst_15 : f32 to vector<16x128xf32>
      %c0_16 = arith.constant 0 : index
      %c0_17 = arith.constant 0 : index
      %42 = vector.load %arg5[%c0_16, %c0_17] : memref<16x128xf32, #tpu.memory_space<vmem>>, vector<16x128xf32>
      tpu.vector_store %arg5[%c0_16, %c0_17], %41 {strides = array<i32>} : memref<16x128xf32, #tpu.memory_space<vmem>>, vector<16x128xf32>,
    } else {
    }
    %c16_i32 = arith.constant 16 : i32
    %3 = arith.muli %arg0, %c16_i32 : i32
    %4 = tpu.iota {dimensions = array<i32: 0>} : vector<16x128xi32>
    %5 = vector.broadcast %3 : i32 to vector<16x128xi32>
    %6 = arith.addi %5, %4 : vector<16x128xi32>
    %7 = tpu.iota {dimensions = array<i32: 1>} : vector<16x128xi32>
    %c16_i32_1 = arith.constant 16 : i32
    %8 = vector.broadcast %c16_i32_1 : i32 to vector<16x128xi32>
    %9 = arith.cmpi slt, %6, %8 : vector<16x128xi32>
    %c4_i32 = arith.constant 4 : i32
    %c0_i32_2 = arith.constant 0 : i32
    %10 = arith.cmpi eq, %c4_i32, %c0_i32_2 : i32
    %c1_i32 = arith.constant 1 : i32
    %11 = arith.select %10, %c1_i32, %c4_i32 : i32
    %12 = vector.broadcast %11 : i32 to vector<16x128xi32>
    %13 = arith.remsi %7, %12 : vector<16x128xi32>
    %c0_i32_3 = arith.constant 0 : i32
    %14 = vector.broadcast %c0_i32_3 : i32 to vector<16x128xi32>
    %15 = arith.cmpi ne, %13, %14 : vector<16x128xi32>
    %c0_i32_4 = arith.constant 0 : i32
    %16 = vector.broadcast %c0_i32_4 : i32 to vector<16x128xi32>
    %17 = arith.cmpi slt, %13, %16 : vector<16x128xi32>
    %c0_i32_5 = arith.constant 0 : i32
    %18 = arith.cmpi slt, %11, %c0_i32_5 : i32
    %19 = vector.broadcast %18 : i1 to vector<16x128xi1>
    %20 = vector.broadcast %19 : vector<16x128xi1> to vector<16x128xi1>
    %21 = arith.xori %17, %20 : vector<16x128xi1>
    %22 = arith.andi %21, %15 : vector<16x128xi1>
    %23 = vector.broadcast %11 : i32 to vector<16x128xi32>
    %24 = arith.addi %13, %23 : vector<16x128xi32>
    %25 = arith.select %22, %24, %13 : vector<16x128xi1>, vector<16x128xi32>
    %c3_i32 = arith.constant 3 : i32
    %26 = vector.broadcast %c3_i32 : i32 to vector<16x128xi32>
    %27 = arith.cmpi eq, %25, %26 : vector<16x128xi32>
    %28 = arith.andi %9, %27 : vector<16x128xi1>
    %c0 = arith.constant 0 : index
    %c0_6 = arith.constant 0 : index
    %29 = vector.load %arg2[%c0, %c0_6] : memref<16x128xf32, #tpu.memory_space<vmem>>, vector<16x128xf32>
    %c0_7 = arith.constant 0 : index
    %c0_8 = arith.constant 0 : index
    %30 = vector.load %arg3[%c0_7, %c0_8] : memref<16x128xf32, #tpu.memory_space<vmem>>, vector<16x128xf32>
    %31 = arith.subf %29, %30 : vector<16x128xf32>
    %32 = math.absf %31 : vector<16x128xf32>
    %c0_9 = arith.constant 0 : index
    %c0_10 = arith.constant 0 : index
    %33 = vector.load %arg5[%c0_9, %c0_10] : memref<16x128xf32, #tpu.memory_space<vmem>>, vector<16x128xf32>
    %cst = arith.constant 0.000000e+00 : f32
    %34 = vector.broadcast %cst : f32 to vector<16x128xf32>
    %35 = arith.select %28, %32, %34 : vector<16x128xi1>, vector<16x128xf32>
    %36 = arith.addf %33, %35 : vector<16x128xf32>
    %c0_11 = arith.constant 0 : index
    %c0_12 = arith.constant 0 : index
    %37 = vector.load %arg5[%c0_11, %c0_12] : memref<16x128xf32, #tpu.memory_space<vmem>>, vector<16x128xf32>
    tpu.vector_store %arg5[%c0_11, %c0_12], %36 {strides = array<i32>} : memref<16x128xf32, #tpu.memory_space<vmem>>, vector<16x128xf32>,
    %c0_i32_13 = arith.constant 0 : i32
    %38 = arith.cmpi eq, %arg0, %c0_i32_13 : i32
    %39 = arith.extui %38 : i1 to i32
    %c0_i32_14 = arith.constant 0 : i32
    %40 = arith.cmpi ne, %39, %c0_i32_14 : i32
    scf.if %40 {
      %c0_15 = arith.constant 0 : index
      %c0_16 = arith.constant 0 : index
      %41 = vector.load %arg5[%c0_15, %c0_16] : memref<16x128xf32, #tpu.memory_space<vmem>>, vector<16x128xf32>
      %42 = vector.shape_cast %41 : vector<16x128xf32> to vector<1x16x128xf32>
      %cst_17 = arith.constant dense<0.000000e+00> : vector<1xf32>
      %43 = vector.multi_reduction <add>, %42, %cst_17 [1, 2] : vector<1x16x128xf32> to vector<1xf32>
      %44 = vector.shape_cast %43 : vector<1xf32> to vector<1x1x1xf32>
      %45 = vector.extract %44[0, 0, 0] : f32 from vector<1x1x1xf32>
      %46 = vector.broadcast %45 : f32 to vector<1x1xf32>
      %c0_18 = arith.constant 0 : index
      %47 = memref.load %arg1[%c0_18] : memref<1xf32, #tpu.memory_space<smem>>
      %48 = vector.broadcast %47 : f32 to vector<1x1xf32>
      %49 = arith.mulf %46, %48 : vector<1x1xf32>
      %c0_19 = arith.constant 0 : index
      %c0_20 = arith.constant 0 : index
      %50 = vector.load %arg4[%c0_19, %c0_20] : memref<1x1xf32, #tpu.memory_space<vmem>>, vector<1x1xf32>
      tpu.vector_store %arg4[%c0_19, %c0_20], %49 {strides = array<i32>} : memref<1x1xf32, #tpu.memory_space<vmem>>, vector<1x1xf32>,
    } else {
    }
    return
  }
  func.func @transform_0(%arg0: i32) -> i32 {
    %c0_i32 = arith.constant 0 : i32
    %c0_i32_0 = arith.constant 0 : i32
    return %c0_i32 : i32
  }
  func.func @transform_1(%arg0: i32) -> (i32, i32) {
    %c0_i32 = arith.constant 0 : i32
    %c0_i32_0 = arith.constant 0 : i32
    return %arg0, %c0_i32 : i32, i32
  }
  func.func @transform_2(%arg0: i32) -> (i32, i32) {
    %c0_i32 = arith.constant 0 : i32
    %c0_i32_0 = arith.constant 0 : i32
    return %arg0, %c0_i32 : i32, i32
  }
  func.func @transform_3(%arg0: i32) -> (i32, i32) {
    %c0_i32 = arith.constant 0 : i32
    %c0_i32_0 = arith.constant 0 : i32
    %c0_i32_1 = arith.constant 0 : i32
    return %c0_i32, %c0_i32_0 : i32, i32
  }
}

</mosaic_0001>

<bundles_post_ra>
// kernel: tpu_custom_call.1
= control target key start
LH: loop header
LB: loop body
LE: loop exit
PB: predicated region body
PF: predicated region fallthrough
CT: control target
= control target key end

     0   :  { %9 = vsyncpa [#allocation5], 0  ;;  %s257_s0 = inlined_call_operand.<no memory space> [shape: f32[1], index: 0, kind: input, shape index: {}]   ;;  %s258_s1 = inlined_call_operand.hbm [shape: f32[16,128], index: 1, kind: input, shape index: {}]   ;;  %s259_s2 = inlined_call_operand.hbm [shape: f32[16,128], index: 2, kind: input, shape index: {}]   ;;  %s260_s3 = inlined_call_operand.hbm [shape: f32[1,1], index: 3, kind: output, shape index: {}]  }
   0x1   :  { %10 = vsyncpa [#allocation8], 0 }
   0x2   :  { %11 = vsyncpa [#allocation6], 0  ;;  %s18_s14 = sshll.u32 %s258_s1, 4  ;;  %s220_s15 = smov [#allocation4]   ;;  %s19_s14 = int_to_ptr.hbm [resolvable:$true] %s18_s14 }
   0x3   :  { %s20_s16 = sshll.u32 %s220_s15, 4  ;;  %s31_s19 = sshll.u32 %s259_s2, 4  ;;  %s21_s16 = int_to_ptr.vmem [resolvable:$true] %s20_s16  ;;  %s32_s19 = int_to_ptr.hbm [resolvable:$true] %s31_s19 }
   0x4   :  { %s221_s20 = smov 128   ;;  %s222_s21 = smov 8  }
   0x5   :  { %26 = dma.hbm_to_vmem [thread:$0]  %s19_s14, 256, %s21_s16, [#allocation5], %s221_s20, %s221_s20, %s222_s21  }
   0x6   :  { %s223_s22 = smov [#allocation7]  }
   0x7   :  { %s33_s23 = sshll.u32 %s223_s22, 4  ;;  %s34_s23 = int_to_ptr.vmem [resolvable:$true] %s33_s23 }
   0x8   :  { %39 = dma.hbm_to_vmem [thread:$0]  %s32_s19, 256, %s34_s23, [#allocation8], %s221_s20, %s221_s20, %s222_s21  }
   0x9   :  { %214 = dma.done.wait [#allocation5], 256  }
   0xa   :  { %215 = vsyncadd [#allocation5], 4294967040 }
   0xb   :  { %216 = dma.done.wait [#allocation8], 256  }
   0xc   :  { %217 = vsyncadd [#allocation8], 4294967040  ;;  %v61_v0 = vlaneseq  ;;  %v80_v3 = vld [vmem:[#allocation4] sm:$0xff]  ;;  %v81_v4 = vld [vmem:[#allocation4 + $0x8] sm:$0xff]  ;;  %v113_v21 = vstv %s257_s0  ;;  %s224_s24 = smov [#allocation9]   ;;  %s124_s28 = sshll.u32 %s260_s3, 4  ;;  %s125_s28 = int_to_ptr.hbm [resolvable:$true] %s124_s28 }
   0xd   :  { %v82_v5 = vld [vmem:[#allocation7] sm:$0xff]  ;;  %v83_v6 = vld [vmem:[#allocation7 + $0x8] sm:$0xff]  ;;  %s122_s25 = sshll.u32 %s224_s24, 4  ;;  %vm115_vm1 = vcmask 0   ;;  %s123_s25 = int_to_ptr.vmem [resolvable:$true] %s122_s25 }
   0xe   :  { %v62_v1 = vand.u32 127, %v61_v0  ;;  %v84_v7 = vsub.f32 %v80_v3, %v82_v5  ;;  %v85_v8 = vsub.f32 %v81_v4, %v83_v6 }
  0x10   :  { %v69_v2 = vand.u32 3, %v62_v1  ;;  %v86_v9 = vand.u32 2147483647, %v84_v7  ;;  %v87_v10 = vand.u32 2147483647, %v85_v8 }
  0x12   :  { %vm77_vm0 = vcmp.eq.s32.totalorder %v69_v2, 3 }
  0x13   :  { %v90_v11 = vsel %vm77_vm0, %v86_v9, 0.0  ;;  %v91_v12 = vsel %vm77_vm0, %v87_v10, 0.0 }
  0x14   :  { %v101_v13 = vadd.f32 %v91_v12, %v90_v11 }
  0x16   :  { %102 = vadd.xlane.f32.xlu0 %v101_v13 }
  0x89   :  { %v103_v14 = vpop.xlane.xlu0 %102 }
  0x8a   :  { %v104_v15 = vrot.slane %v103_v14, 4 }
  0x8c   :  { %v105_v16 = vadd.f32 %v104_v15, %v103_v14 }
  0x8e   :  { %v106_v17 = vrot.slane %v105_v16, 2 }
  0x90   :  { %v107_v18 = vadd.f32 %v106_v17, %v105_v16 }
  0x92   :  { %v108_v19 = vrot.slane %v107_v18, 1 }
  0x94   :  { %v109_v20 = vadd.f32 %v108_v19, %v107_v18 }
  0x96   :  { %135 = vpush %v109_v20 }
  0xc7   :  { %s136_s29 = spop %135 }
  0xc8   :  { %v111_v22 = vstv %s136_s29 }
  0xc9   :  { %v114_v23 = vmul.f32 %v113_v21, %v111_v22 }
  0xcb   :  { %116 = vst.msk [vmem:[#allocation9] sm:$0x1] %vm115_vm1, %v114_v23 }
  0xcc   :  { %127 = dma.vmem_to_hbm [thread:$0]  %s123_s25, 16, %s125_s28, [#allocation6]  }
  0xcd   :  { %218 = dma.done.wait [#allocation6], 16  }
  0xce   :  { %219 = vsyncadd [#allocation6], 4294967280 }
  0xcf   :  { %132 = vsyncpa [#allocation5], 1 }
  0xd0   :  { %133 = vsyncpa [#allocation8], 1 }
  0xd1   :  { %134 = vsyncpa [#allocation6], 1 }

</bundles_post_ra>
